<compile_context>
chip_gen: v6e
topology: v6e:2x2x1
jax: 0.10.0
libtpu: 0.0.40
codegen_flags: <defaults>
</compile_context>

<pallas_src>
import functools

import jax
import jax.numpy as jnp
from jax import lax
from jax.experimental import pallas as pl
from jax.experimental.pallas import tpu as pltpu

EPS = 1e-5  # nn.InstanceNorm2d default eps
TAPS = tuple((dy, dx) for dy in (-1, 0, 1) for dx in (-1, 0, 1))  # k = (dy+1)*3+(dx+1)


# ---------------------------------------------------------------------------
# In-kernel helpers
# ---------------------------------------------------------------------------
def _im2col_slab(x, mask_ref, H, W):
    """Build the (9*Cin, H*W) im2col slab from a (Cin, H*W) activation.

    result[k*Cin + ci, p] = x[ci, p + dy*W + dx]   (0 where the tap falls
    outside the HxW image; the precomputed mask also kills the roll wrap).
    """
    HW = H * W
    slabs = []
    for k, (dy, dx) in enumerate(TAPS):
        off = dy * W + dx
        # result[:, p] = x[:, (p + off) % HW]  ==  roll by -off (XLU, not VALU)
        shifted = x if off == 0 else pltpu.roll(x, (-off) % HW, axis=1)
        slabs.append(shifted * mask_ref[k])          # mask_ref[k]: (1, HW) f32
    return jnp.concatenate(slabs, axis=0)            # (9*Cin, HW) f32


def _conv3x3(x, mask_ref, w_ref, b_ref, H, W):
    """3x3 conv, stride 1, pad 1, + bias — a single MXU matmul.

    w_ref: (Cout, 9*Cin) bf16, tap-major rows (row = k*Cin + cin).
    b_ref: (Cout, 1) f32.
    """
    slab = _im2col_slab(x, mask_ref, H, W)
    y = jnp.dot(w_ref[...], slab.astype(w_ref.dtype),
                preferred_element_type=jnp.float32)
    return y + b_ref[...]


def _instance_norm(y):
    # nn.InstanceNorm2d(affine=False): per-(sample, channel) stats over H*W.
    mean = jnp.mean(y, axis=1, keepdims=True)
    d = y - mean
    var = jnp.mean(d * d, axis=1, keepdims=True)     # two-pass: never negative
    return d * lax.rsqrt(var + EPS)


# ---------------------------------------------------------------------------
# Fused ResBlock kernel (one batch sample per grid step)
# ---------------------------------------------------------------------------
def resblock_kernel(mask_ref, x_ref, w1_ref, b1_ref, a_ref, w2_ref, b2_ref,
                    o_ref, *, H, W):
    x = x_ref[...]                                     # (C, H*W) f32
    h = _conv3x3(x, mask_ref, w1_ref, b1_ref, H, W)    # conv1 + bias
    h = _instance_norm(h)
    h = jnp.where(h >= 0.0, h, a_ref[...] * h)         # PReLU (single shared param)
    h = _conv3x3(h, mask_ref, w2_ref, b2_ref, H, W)    # conv2 + bias
    h = _instance_norm(h)
    o_ref[...] = h + x                                 # residual


# ---------------------------------------------------------------------------
# Wrapper: layout conversion + parameter / mask packing
# ---------------------------------------------------------------------------
def res_block(x_nchw, params):
    N, C, H, W = x_nchw.shape
    HW = H * W
    x_flat = x_nchw.reshape(N, C, HW).astype(jnp.float32)

    # Per-tap validity masks, computed once here (not 36x inside the kernel).
    ys = jnp.arange(HW, dtype=jnp.int32) // W
    xs = jnp.arange(HW, dtype=jnp.int32) % W
    mask = jnp.stack([((ys + dy >= 0) & (ys + dy < H) &
                       (xs + dx >= 0) & (xs + dx < W)).astype(jnp.float32)
                      for dy, dx in TAPS]).reshape(9, 1, HW)

    def prep_w(w):   # (Cout, Cin, 3, 3) -> (Cout, 9*Cin) bf16, tap-major
        o, i = w.shape[0], w.shape[1]
        return jnp.transpose(w, (0, 2, 3, 1)).reshape(o, 9 * i).astype(jnp.bfloat16)

    def prep_b(b):
        return b.reshape(-1, 1).astype(jnp.float32)

    w1, b1 = prep_w(params["w1"]), prep_b(params["b1"])
    w2, b2 = prep_w(params["w2"]), prep_b(params["b2"])
    a = jnp.asarray(params["a"], jnp.float32).reshape(1, 1)

    def full_spec(shape):
        ndim = len(shape)
        return pl.BlockSpec(shape, lambda n: (0,) * ndim)

    sample_spec = pl.BlockSpec((pl.Squeezed(), C, HW), lambda n: (n, 0, 0))

    kernel = functools.partial(resblock_kernel, H=H, W=W)
    out = pl.pallas_call(
        kernel,
        out_shape=jax.ShapeDtypeStruct((N, C, HW), jnp.float32),
        grid_spec=pltpu.PrefetchScalarGridSpec(
            num_scalar_prefetch=0,
            grid=(N,),
            in_specs=[
                full_spec((9, 1, HW)),                       # tap masks
                sample_spec,                                 # x
                full_spec((C, 9 * C)), full_spec((C, 1)),    # conv1 w, b
                full_spec((1, 1)),                           # PReLU a
                full_spec((C, 9 * C)), full_spec((C, 1)),    # conv2 w, b
            ],
            out_specs=sample_spec,
        ),
        compiler_params=pltpu.CompilerParams(
            dimension_semantics=("parallel",)),
    )(mask, x_flat, w1, b1, a, w2, b2)
    return out.reshape(N, C, H, W)


# ---------------------------------------------------------------------------
# Pure-JAX reference (mirrors the PyTorch module) for verification
# ---------------------------------------------------------------------------
def _conv2d_ref(x, w, b):
    y = lax.conv_general_dilated(
        x, w, window_strides=(1, 1), padding=((1, 1), (1, 1)),
        dimension_numbers=("NCHW", "OIHW", "NCHW"),
        precision=lax.Precision.HIGHEST)
    return y + b[None, :, None, None]


def _inorm_ref(x):
    m = jnp.mean(x, axis=(2, 3), keepdims=True)
    v = jnp.mean((x - m) ** 2, axis=(2, 3), keepdims=True)
    return (x - m) / jnp.sqrt(v + EPS)


def resblock_ref(x, p):
    h = _inorm_ref(_conv2d_ref(x, p["w1"], p["b1"]))
    h = jnp.where(h >= 0, h, p["a"] * h)
    h = _inorm_ref(_conv2d_ref(h, p["w2"], p["b2"]))
    return h + x


# ---------------------------------------------------------------------------
if __name__ == "__main__":
    key = jax.random.PRNGKey(0)
    N, C, H, W = 2, 8, 16, 16   # ResBlock(planes=C); small, sublane-friendly
    keys = jax.random.split(key, 5)
    x = jax.random.normal(keys[0], (N, C, H, W), jnp.float32)

    params = dict(
        w1=0.1 * jax.random.normal(keys[1], (C, C, 3, 3), jnp.float32),
        b1=0.1 * jax.random.normal(keys[2], (C,), jnp.float32),
        a=jnp.float32(0.25),                     # nn.PReLU() default init
        w2=0.1 * jax.random.normal(keys[3], (C, C, 3, 3), jnp.float32),
        b2=0.1 * jax.random.normal(keys[4], (C,), jnp.float32),
    )

    out = jax.block_until_ready(res_block(x, params))
    ref = resblock_ref(x, params)

    assert out.shape == (N, C, H, W)
    if not jnp.allclose(out, ref, rtol=2e-2, atol=2e-2):
        max_err = float(jnp.max(jnp.abs(out - ref)))
        raise AssertionError(f"Pallas ResBlock mismatch, max abs err={max_err}")
    print("KERNEL_OK")
</pallas_src>

<mosaic_0001>
module attributes {stable_mosaic.version = 11 : i64} {
  func.func @resblock_kernel(%arg0: i32, %arg1: memref<9x1x256xf32, #tpu.memory_space<vmem>>, %arg2: memref<1x8x256xf32, #tpu.memory_space<vmem>>, %arg3: memref<8x72xbf16, #tpu.memory_space<vmem>>, %arg4: memref<8x1xf32, #tpu.memory_space<vmem>>, %arg5: memref<1x1xf32, #tpu.memory_space<vmem>>, %arg6: memref<8x72xbf16, #tpu.memory_space<vmem>>, %arg7: memref<8x1xf32, #tpu.memory_space<vmem>>, %arg8: memref<1x8x256xf32, #tpu.memory_space<vmem>>) attributes {dimension_semantics = [#tpu.dimension_semantics<parallel>], iteration_bounds = array<i64: 2>, scalar_prefetch = 0 : i64, scratch_operands = 0 : i64, tpu.core_type = #tpu.core_type<tc>, window_params = [{pipeline_mode = #tpu.pipeline_mode<synchronous>, transform_indices = @transform_0, window_bounds = array<i64: 9, 1, 256>}, {transform_indices = @transform_1, window_bounds = array<i64: 1, 8, 256>}, {pipeline_mode = #tpu.pipeline_mode<synchronous>, transform_indices = @transform_2, window_bounds = array<i64: 8, 72>}, {pipeline_mode = #tpu.pipeline_mode<synchronous>, transform_indices = @transform_3, window_bounds = array<i64: 8, 1>}, {pipeline_mode = #tpu.pipeline_mode<synchronous>, transform_indices = @transform_4, window_bounds = array<i64: 1, 1>}, {pipeline_mode = #tpu.pipeline_mode<synchronous>, transform_indices = @transform_5, window_bounds = array<i64: 8, 72>}, {pipeline_mode = #tpu.pipeline_mode<synchronous>, transform_indices = @transform_6, window_bounds = array<i64: 8, 1>}, {transform_indices = @transform_7, window_bounds = array<i64: 1, 8, 256>}]} {
    %c0 = arith.constant 0 : index
    %c0_0 = arith.constant 0 : index
    %c0_1 = arith.constant 0 : index
    %0 = vector.load %arg2[%c0, %c0_0, %c0_1] : memref<1x8x256xf32, #tpu.memory_space<vmem>>, vector<1x8x256xf32>
    %1 = vector.shape_cast %0 : vector<1x8x256xf32> to vector<8x256xf32>
    %c17_i32 = arith.constant 17 : i32
    %2 = tpu.dynamic_rotate %1 by %c17_i32 dim 1 : vector<8x256xf32>, i32 -> vector<8x256xf32>
    %c0_2 = arith.constant 0 : index
    %c0_3 = arith.constant 0 : index
    %c0_4 = arith.constant 0 : index
    %3 = vector.load %arg1[%c0_2, %c0_3, %c0_4] : memref<9x1x256xf32, #tpu.memory_space<vmem>>, vector<1x1x256xf32>
    %4 = vector.shape_cast %3 : vector<1x1x256xf32> to vector<1x256xf32>
    %5 = vector.broadcast %4 : vector<1x256xf32> to vector<8x256xf32>
    %6 = arith.mulf %2, %5 : vector<8x256xf32>
    %c16_i32 = arith.constant 16 : i32
    %7 = tpu.dynamic_rotate %1 by %c16_i32 dim 1 : vector<8x256xf32>, i32 -> vector<8x256xf32>
    %c1 = arith.constant 1 : index
    %c0_5 = arith.constant 0 : index
    %c0_6 = arith.constant 0 : index
    %8 = vector.load %arg1[%c1, %c0_5, %c0_6] : memref<9x1x256xf32, #tpu.memory_space<vmem>>, vector<1x1x256xf32>
    %9 = vector.shape_cast %8 : vector<1x1x256xf32> to vector<1x256xf32>
    %10 = vector.broadcast %9 : vector<1x256xf32> to vector<8x256xf32>
    %11 = arith.mulf %7, %10 : vector<8x256xf32>
    %c15_i32 = arith.constant 15 : i32
    %12 = tpu.dynamic_rotate %1 by %c15_i32 dim 1 : vector<8x256xf32>, i32 -> vector<8x256xf32>
    %c2 = arith.constant 2 : index
    %c0_7 = arith.constant 0 : index
    %c0_8 = arith.constant 0 : index
    %13 = vector.load %arg1[%c2, %c0_7, %c0_8] : memref<9x1x256xf32, #tpu.memory_space<vmem>>, vector<1x1x256xf32>
    %14 = vector.shape_cast %13 : vector<1x1x256xf32> to vector<1x256xf32>
    %15 = vector.broadcast %14 : vector<1x256xf32> to vector<8x256xf32>
    %16 = arith.mulf %12, %15 : vector<8x256xf32>
    %c1_i32 = arith.constant 1 : i32
    %17 = tpu.dynamic_rotate %1 by %c1_i32 dim 1 : vector<8x256xf32>, i32 -> vector<8x256xf32>
    %c3 = arith.constant 3 : index
    %c0_9 = arith.constant 0 : index
    %c0_10 = arith.constant 0 : index
    %18 = vector.load %arg1[%c3, %c0_9, %c0_10] : memref<9x1x256xf32, #tpu.memory_space<vmem>>, vector<1x1x256xf32>
    %19 = vector.shape_cast %18 : vector<1x1x256xf32> to vector<1x256xf32>
    %20 = vector.broadcast %19 : vector<1x256xf32> to vector<8x256xf32>
    %21 = arith.mulf %17, %20 : vector<8x256xf32>
    %c4 = arith.constant 4 : index
    %c0_11 = arith.constant 0 : index
    %c0_12 = arith.constant 0 : index
    %22 = vector.load %arg1[%c4, %c0_11, %c0_12] : memref<9x1x256xf32, #tpu.memory_space<vmem>>, vector<1x1x256xf32>
    %23 = vector.shape_cast %22 : vector<1x1x256xf32> to vector<1x256xf32>
    %24 = vector.broadcast %23 : vector<1x256xf32> to vector<8x256xf32>
    %25 = arith.mulf %1, %24 : vector<8x256xf32>
    %c255_i32 = arith.constant 255 : i32
    %26 = tpu.dynamic_rotate %1 by %c255_i32 dim 1 : vector<8x256xf32>, i32 -> vector<8x256xf32>
    %c5 = arith.constant 5 : index
    %c0_13 = arith.constant 0 : index
    %c0_14 = arith.constant 0 : index
    %27 = vector.load %arg1[%c5, %c0_13, %c0_14] : memref<9x1x256xf32, #tpu.memory_space<vmem>>, vector<1x1x256xf32>
    %28 = vector.shape_cast %27 : vector<1x1x256xf32> to vector<1x256xf32>
    %29 = vector.broadcast %28 : vector<1x256xf32> to vector<8x256xf32>
    %30 = arith.mulf %26, %29 : vector<8x256xf32>
    %c241_i32 = arith.constant 241 : i32
    %31 = tpu.dynamic_rotate %1 by %c241_i32 dim 1 : vector<8x256xf32>, i32 -> vector<8x256xf32>
    %c6 = arith.constant 6 : index
    %c0_15 = arith.constant 0 : index
    %c0_16 = arith.constant 0 : index
    %32 = vector.load %arg1[%c6, %c0_15, %c0_16] : memref<9x1x256xf32, #tpu.memory_space<vmem>>, vector<1x1x256xf32>
    %33 = vector.shape_cast %32 : vector<1x1x256xf32> to vector<1x256xf32>
    %34 = vector.broadcast %33 : vector<1x256xf32> to vector<8x256xf32>
    %35 = arith.mulf %31, %34 : vector<8x256xf32>
    %c240_i32 = arith.constant 240 : i32
    %36 = tpu.dynamic_rotate %1 by %c240_i32 dim 1 : vector<8x256xf32>, i32 -> vector<8x256xf32>
    %c7 = arith.constant 7 : index
    %c0_17 = arith.constant 0 : index
    %c0_18 = arith.constant 0 : index
    %37 = vector.load %arg1[%c7, %c0_17, %c0_18] : memref<9x1x256xf32, #tpu.memory_space<vmem>>, vector<1x1x256xf32>
    %38 = vector.shape_cast %37 : vector<1x1x256xf32> to vector<1x256xf32>
    %39 = vector.broadcast %38 : vector<1x256xf32> to vector<8x256xf32>
    %40 = arith.mulf %36, %39 : vector<8x256xf32>
    %c239_i32 = arith.constant 239 : i32
    %41 = tpu.dynamic_rotate %1 by %c239_i32 dim 1 : vector<8x256xf32>, i32 -> vector<8x256xf32>
    %c8 = arith.constant 8 : index
    %c0_19 = arith.constant 0 : index
    %c0_20 = arith.constant 0 : index
    %42 = vector.load %arg1[%c8, %c0_19, %c0_20] : memref<9x1x256xf32, #tpu.memory_space<vmem>>, vector<1x1x256xf32>
    %43 = vector.shape_cast %42 : vector<1x1x256xf32> to vector<1x256xf32>
    %44 = vector.broadcast %43 : vector<1x256xf32> to vector<8x256xf32>
    %45 = arith.mulf %41, %44 : vector<8x256xf32>
    %46 = tpu.concatenate %6, %11, %16, %21, %25, %30, %35, %40, %45 in 0 : vector<8x256xf32>, vector<8x256xf32>, vector<8x256xf32>, vector<8x256xf32>, vector<8x256xf32>, vector<8x256xf32>, vector<8x256xf32>, vector<8x256xf32>, vector<8x256xf32> -> vector<72x256xf32>
    %c0_21 = arith.constant 0 : index
    %c0_22 = arith.constant 0 : index
    %47 = vector.load %arg3[%c0_21, %c0_22] : memref<8x72xbf16, #tpu.memory_space<vmem>>, vector<8x72xbf16>
    %48 = arith.truncf %46 : vector<72x256xf32> to vector<72x256xbf16>
    %cst = arith.constant dense<0.000000e+00> : vector<8x256xf32>
    %49 = tpu.matmul %47, %48, %cst {dimension_numbers = #tpu.dot_dimension_numbers<[1], [0], [0], [1], [0, 0, 1, 1], [], []>} : vector<8x72xbf16>, vector<72x256xbf16>, vector<8x256xf32> -> vector<8x256xf32>
    %c0_23 = arith.constant 0 : index
    %c0_24 = arith.constant 0 : index
    %50 = vector.load %arg4[%c0_23, %c0_24] : memref<8x1xf32, #tpu.memory_space<vmem>>, vector<8x1xf32>
    %51 = vector.broadcast %50 : vector<8x1xf32> to vector<8x256xf32>
    %52 = arith.addf %49, %51 : vector<8x256xf32>
    %cst_25 = arith.constant dense<0.000000e+00> : vector<8xf32>
    %53 = vector.multi_reduction <add>, %52, %cst_25 [1] : vector<8x256xf32> to vector<8xf32>
    %54 = vector.shape_cast %53 : vector<8xf32> to vector<8x1xf32>
    %cst_26 = arith.constant 2.560000e+02 : f32
    %55 = vector.broadcast %cst_26 : f32 to vector<8x1xf32>
    %56 = arith.divf %54, %55 : vector<8x1xf32>
    %57 = vector.broadcast %56 : vector<8x1xf32> to vector<8x256xf32>
    %58 = arith.subf %52, %57 : vector<8x256xf32>
    %59 = arith.mulf %58, %58 : vector<8x256xf32>
    %cst_27 = arith.constant dense<0.000000e+00> : vector<8xf32>
    %60 = vector.multi_reduction <add>, %59, %cst_27 [1] : vector<8x256xf32> to vector<8xf32>
    %61 = vector.shape_cast %60 : vector<8xf32> to vector<8x1xf32>
    %cst_28 = arith.constant 2.560000e+02 : f32
    %62 = vector.broadcast %cst_28 : f32 to vector<8x1xf32>
    %63 = arith.divf %61, %62 : vector<8x1xf32>
    %cst_29 = arith.constant 9.99999974E-6 : f32
    %64 = vector.broadcast %cst_29 : f32 to vector<8x1xf32>
    %65 = arith.addf %63, %64 : vector<8x1xf32>
    %66 = math.rsqrt %65 : vector<8x1xf32>
    %67 = vector.broadcast %66 : vector<8x1xf32> to vector<8x256xf32>
    %68 = arith.mulf %58, %67 : vector<8x256xf32>
    %cst_30 = arith.constant 0.000000e+00 : f32
    %69 = vector.broadcast %cst_30 : f32 to vector<8x256xf32>
    %70 = arith.cmpf oge, %68, %69 : vector<8x256xf32>
    %c0_31 = arith.constant 0 : index
    %c0_32 = arith.constant 0 : index
    %71 = vector.load %arg5[%c0_31, %c0_32] : memref<1x1xf32, #tpu.memory_space<vmem>>, vector<1x1xf32>
    %72 = vector.broadcast %71 : vector<1x1xf32> to vector<8x256xf32>
    %73 = arith.mulf %72, %68 : vector<8x256xf32>
    %74 = arith.select %70, %68, %73 : vector<8x256xi1>, vector<8x256xf32>
    %c17_i32_33 = arith.constant 17 : i32
    %75 = tpu.dynamic_rotate %74 by %c17_i32_33 dim 1 : vector<8x256xf32>, i32 -> vector<8x256xf32>
    %c0_34 = arith.constant 0 : index
    %c0_35 = arith.constant 0 : index
    %c0_36 = arith.constant 0 : index
    %76 = vector.load %arg1[%c0_34, %c0_35, %c0_36] : memref<9x1x256xf32, #tpu.memory_space<vmem>>, vector<1x1x256xf32>
    %77 = vector.shape_cast %76 : vector<1x1x256xf32> to vector<1x256xf32>
    %78 = vector.broadcast %77 : vector<1x256xf32> to vector<8x256xf32>
    %79 = arith.mulf %75, %78 : vector<8x256xf32>
    %c16_i32_37 = arith.constant 16 : i32
    %80 = tpu.dynamic_rotate %74 by %c16_i32_37 dim 1 : vector<8x256xf32>, i32 -> vector<8x256xf32>
    %c1_38 = arith.constant 1 : index
    %c0_39 = arith.constant 0 : index
    %c0_40 = arith.constant 0 : index
    %81 = vector.load %arg1[%c1_38, %c0_39, %c0_40] : memref<9x1x256xf32, #tpu.memory_space<vmem>>, vector<1x1x256xf32>
    %82 = vector.shape_cast %81 : vector<1x1x256xf32> to vector<1x256xf32>
    %83 = vector.broadcast %82 : vector<1x256xf32> to vector<8x256xf32>
    %84 = arith.mulf %80, %83 : vector<8x256xf32>
    %c15_i32_41 = arith.constant 15 : i32
    %85 = tpu.dynamic_rotate %74 by %c15_i32_41 dim 1 : vector<8x256xf32>, i32 -> vector<8x256xf32>
    %c2_42 = arith.constant 2 : index
    %c0_43 = arith.constant 0 : index
    %c0_44 = arith.constant 0 : index
    %86 = vector.load %arg1[%c2_42, %c0_43, %c0_44] : memref<9x1x256xf32, #tpu.memory_space<vmem>>, vector<1x1x256xf32>
    %87 = vector.shape_cast %86 : vector<1x1x256xf32> to vector<1x256xf32>
    %88 = vector.broadcast %87 : vector<1x256xf32> to vector<8x256xf32>
    %89 = arith.mulf %85, %88 : vector<8x256xf32>
    %c1_i32_45 = arith.constant 1 : i32
    %90 = tpu.dynamic_rotate %74 by %c1_i32_45 dim 1 : vector<8x256xf32>, i32 -> vector<8x256xf32>
    %c3_46 = arith.constant 3 : index
    %c0_47 = arith.constant 0 : index
    %c0_48 = arith.constant 0 : index
    %91 = vector.load %arg1[%c3_46, %c0_47, %c0_48] : memref<9x1x256xf32, #tpu.memory_space<vmem>>, vector<1x1x256xf32>
    %92 = vector.shape_cast %91 : vector<1x1x256xf32> to vector<1x256xf32>
    %93 = vector.broadcast %92 : vector<1x256xf32> to vector<8x256xf32>
    %94 = arith.mulf %90, %93 : vector<8x256xf32>
    %c4_49 = arith.constant 4 : index
    %c0_50 = arith.constant 0 : index
    %c0_51 = arith.constant 0 : index
    %95 = vector.load %arg1[%c4_49, %c0_50, %c0_51] : memref<9x1x256xf32, #tpu.memory_space<vmem>>, vector<1x1x256xf32>
    %96 = vector.shape_cast %95 : vector<1x1x256xf32> to vector<1x256xf32>
    %97 = vector.broadcast %96 : vector<1x256xf32> to vector<8x256xf32>
    %98 = arith.mulf %74, %97 : vector<8x256xf32>
    %c255_i32_52 = arith.constant 255 : i32
    %99 = tpu.dynamic_rotate %74 by %c255_i32_52 dim 1 : vector<8x256xf32>, i32 -> vector<8x256xf32>
    %c5_53 = arith.constant 5 : index
    %c0_54 = arith.constant 0 : index
    %c0_55 = arith.constant 0 : index
    %100 = vector.load %arg1[%c5_53, %c0_54, %c0_55] : memref<9x1x256xf32, #tpu.memory_space<vmem>>, vector<1x1x256xf32>
    %101 = vector.shape_cast %100 : vector<1x1x256xf32> to vector<1x256xf32>
    %102 = vector.broadcast %101 : vector<1x256xf32> to vector<8x256xf32>
    %103 = arith.mulf %99, %102 : vector<8x256xf32>
    %c241_i32_56 = arith.constant 241 : i32
    %104 = tpu.dynamic_rotate %74 by %c241_i32_56 dim 1 : vector<8x256xf32>, i32 -> vector<8x256xf32>
    %c6_57 = arith.constant 6 : index
    %c0_58 = arith.constant 0 : index
    %c0_59 = arith.constant 0 : index
    %105 = vector.load %arg1[%c6_57, %c0_58, %c0_59] : memref<9x1x256xf32, #tpu.memory_space<vmem>>, vector<1x1x256xf32>
    %106 = vector.shape_cast %105 : vector<1x1x256xf32> to vector<1x256xf32>
    %107 = vector.broadcast %106 : vector<1x256xf32> to vector<8x256xf32>
    %108 = arith.mulf %104, %107 : vector<8x256xf32>
    %c240_i32_60 = arith.constant 240 : i32
    %109 = tpu.dynamic_rotate %74 by %c240_i32_60 dim 1 : vector<8x256xf32>, i32 -> vector<8x256xf32>
    %c7_61 = arith.constant 7 : index
    %c0_62 = arith.constant 0 : index
    %c0_63 = arith.constant 0 : index
    %110 = vector.load %arg1[%c7_61, %c0_62, %c0_63] : memref<9x1x256xf32, #tpu.memory_space<vmem>>, vector<1x1x256xf32>
    %111 = vector.shape_cast %110 : vector<1x1x256xf32> to vector<1x256xf32>
    %112 = vector.broadcast %111 : vector<1x256xf32> to vector<8x256xf32>
    %113 = arith.mulf %109, %112 : vector<8x256xf32>
    %c239_i32_64 = arith.constant 239 : i32
    %114 = tpu.dynamic_rotate %74 by %c239_i32_64 dim 1 : vector<8x256xf32>, i32 -> vector<8x256xf32>
    %c8_65 = arith.constant 8 : index
    %c0_66 = arith.constant 0 : index
    %c0_67 = arith.constant 0 : index
    %115 = vector.load %arg1[%c8_65, %c0_66, %c0_67] : memref<9x1x256xf32, #tpu.memory_space<vmem>>, vector<1x1x256xf32>
    %116 = vector.shape_cast %115 : vector<1x1x256xf32> to vector<1x256xf32>
    %117 = vector.broadcast %116 : vector<1x256xf32> to vector<8x256xf32>
    %118 = arith.mulf %114, %117 : vector<8x256xf32>
    %119 = tpu.concatenate %79, %84, %89, %94, %98, %103, %108, %113, %118 in 0 : vector<8x256xf32>, vector<8x256xf32>, vector<8x256xf32>, vector<8x256xf32>, vector<8x256xf32>, vector<8x256xf32>, vector<8x256xf32>, vector<8x256xf32>, vector<8x256xf32> -> vector<72x256xf32>
    %c0_68 = arith.constant 0 : index
    %c0_69 = arith.constant 0 : index
    %120 = vector.load %arg6[%c0_68, %c0_69] : memref<8x72xbf16, #tpu.memory_space<vmem>>, vector<8x72xbf16>
    %121 = arith.truncf %119 : vector<72x256xf32> to vector<72x256xbf16>
    %cst_70 = arith.constant dense<0.000000e+00> : vector<8x256xf32>
    %122 = tpu.matmul %120, %121, %cst_70 {dimension_numbers = #tpu.dot_dimension_numbers<[1], [0], [0], [1], [0, 0, 1, 1], [], []>} : vector<8x72xbf16>, vector<72x256xbf16>, vector<8x256xf32> -> vector<8x256xf32>
    %c0_71 = arith.constant 0 : index
    %c0_72 = arith.constant 0 : index
    %123 = vector.load %arg7[%c0_71, %c0_72] : memref<8x1xf32, #tpu.memory_space<vmem>>, vector<8x1xf32>
    %124 = vector.broadcast %123 : vector<8x1xf32> to vector<8x256xf32>
    %125 = arith.addf %122, %124 : vector<8x256xf32>
    %cst_73 = arith.constant dense<0.000000e+00> : vector<8xf32>
    %126 = vector.multi_reduction <add>, %125, %cst_73 [1] : vector<8x256xf32> to vector<8xf32>
    %127 = vector.shape_cast %126 : vector<8xf32> to vector<8x1xf32>
    %cst_74 = arith.constant 2.560000e+02 : f32
    %128 = vector.broadcast %cst_74 : f32 to vector<8x1xf32>
    %129 = arith.divf %127, %128 : vector<8x1xf32>
    %130 = vector.broadcast %129 : vector<8x1xf32> to vector<8x256xf32>
    %131 = arith.subf %125, %130 : vector<8x256xf32>
    %132 = arith.mulf %131, %131 : vector<8x256xf32>
    %cst_75 = arith.constant dense<0.000000e+00> : vector<8xf32>
    %133 = vector.multi_reduction <add>, %132, %cst_75 [1] : vector<8x256xf32> to vector<8xf32>
    %134 = vector.shape_cast %133 : vector<8xf32> to vector<8x1xf32>
    %cst_76 = arith.constant 2.560000e+02 : f32
    %135 = vector.broadcast %cst_76 : f32 to vector<8x1xf32>
    %136 = arith.divf %134, %135 : vector<8x1xf32>
    %cst_77 = arith.constant 9.99999974E-6 : f32
    %137 = vector.broadcast %cst_77 : f32 to vector<8x1xf32>
    %138 = arith.addf %136, %137 : vector<8x1xf32>
    %139 = math.rsqrt %138 : vector<8x1xf32>
    %140 = vector.broadcast %139 : vector<8x1xf32> to vector<8x256xf32>
    %141 = arith.mulf %131, %140 : vector<8x256xf32>
    %142 = arith.addf %141, %1 : vector<8x256xf32>
    %c0_78 = arith.constant 0 : index
    %c0_79 = arith.constant 0 : index
    %c0_80 = arith.constant 0 : index
    %143 = vector.load %arg8[%c0_78, %c0_79, %c0_80] : memref<1x8x256xf32, #tpu.memory_space<vmem>>, vector<1x8x256xf32>
    %144 = vector.shape_cast %143 : vector<1x8x256xf32> to vector<8x256xf32>
    %145 = vector.shape_cast %142 : vector<8x256xf32> to vector<1x8x256xf32>
    tpu.vector_store %arg8[%c0_78, %c0_79, %c0_80], %145 {strides = array<i32>} : memref<1x8x256xf32, #tpu.memory_space<vmem>>, vector<1x8x256xf32>,
    return
  }
  func.func @transform_0(%arg0: i32) -> (i32, i32, i32) {
    %c0_i32 = arith.constant 0 : i32
    %c0_i32_0 = arith.constant 0 : i32
    %c0_i32_1 = arith.constant 0 : i32
    %c0_i32_2 = arith.constant 0 : i32
    return %c0_i32, %c0_i32_0, %c0_i32_1 : i32, i32, i32
  }
  func.func @transform_1(%arg0: i32) -> (i32, i32, i32) {
    %c0_i32 = arith.constant 0 : i32
    %c0_i32_0 = arith.constant 0 : i32
    %c0_i32_1 = arith.constant 0 : i32
    return %arg0, %c0_i32, %c0_i32_0 : i32, i32, i32
  }
  func.func @transform_2(%arg0: i32) -> (i32, i32) {
    %c0_i32 = arith.constant 0 : i32
    %c0_i32_0 = arith.constant 0 : i32
    %c0_i32_1 = arith.constant 0 : i32
    return %c0_i32, %c0_i32_0 : i32, i32
  }
  func.func @transform_3(%arg0: i32) -> (i32, i32) {
    %c0_i32 = arith.constant 0 : i32
    %c0_i32_0 = arith.constant 0 : i32
    %c0_i32_1 = arith.constant 0 : i32
    return %c0_i32, %c0_i32_0 : i32, i32
  }
  func.func @transform_4(%arg0: i32) -> (i32, i32) {
    %c0_i32 = arith.constant 0 : i32
    %c0_i32_0 = arith.constant 0 : i32
    %c0_i32_1 = arith.constant 0 : i32
    return %c0_i32, %c0_i32_0 : i32, i32
  }
  func.func @transform_5(%arg0: i32) -> (i32, i32) {
    %c0_i32 = arith.constant 0 : i32
    %c0_i32_0 = arith.constant 0 : i32
    %c0_i32_1 = arith.constant 0 : i32
    return %c0_i32, %c0_i32_0 : i32, i32
  }
  func.func @transform_6(%arg0: i32) -> (i32, i32) {
    %c0_i32 = arith.constant 0 : i32
    %c0_i32_0 = arith.constant 0 : i32
    %c0_i32_1 = arith.constant 0 : i32
    return %c0_i32, %c0_i32_0 : i32, i32
  }
  func.func @transform_7(%arg0: i32) -> (i32, i32, i32) {
    %c0_i32 = arith.constant 0 : i32
    %c0_i32_0 = arith.constant 0 : i32
    %c0_i32_1 = arith.constant 0 : i32
    return %arg0, %c0_i32, %c0_i32_0 : i32, i32, i32
  }
}

</mosaic_0001>

<bundles_post_ra>
// kernel: tpu_custom_call.1
= control target key start
LH: loop header
LB: loop body
LE: loop exit
PB: predicated region body
PF: predicated region fallthrough
CT: control target
= control target key end

     0   :  { %s1490_s0 = inlined_call_operand.vmem [shape: f32[9,1,256], index: 0, kind: input, shape index: {}]   ;;  %s1491_s1 = inlined_call_operand.hbm [shape: f32[2,8,256], index: 1, kind: input, shape index: {}]   ;;  %s1492_s2 = inlined_call_operand.vmem [shape: bf16[8,72], index: 2, kind: input, shape index: {}]   ;;  %s1493_s3 = inlined_call_operand.vmem [shape: f32[8,1], index: 3, kind: input, shape index: {}]   ;;  %s1494_s4 = inlined_call_operand.<no memory space> [shape: f32[1,1], index: 4, kind: input, shape index: {}]   ;;  %s1495_s5 = inlined_call_operand.vmem [shape: bf16[8,72], index: 5, kind: input, shape index: {}]   ;;  %s1496_s6 = inlined_call_operand.vmem [shape: f32[8,1], index: 6, kind: input, shape index: {}]   ;;  %s1497_s7 = inlined_call_operand.hbm [shape: f32[2,8,256], index: 7, kind: output, shape index: {}]  }
   0x1   :  { %v12_v0 = vstv %s1494_s4 }
   0x2   :  { %13 = vst [vmem:[#allocation2] sm:$0x1] %v12_v0 }
   0x3   :  { %14 = vsyncpa [#allocation4], 0 }
   0x4   :  { %16 = vsyncpa [#allocation4 + $0x1], 0 }
   0x5   :  { %17 = vsyncpa [#allocation5], 0 }
   0x6   :  { %19 = vsyncpa [#allocation5 + $0x1], 0  ;;  %s1070_s26 = smov 0   ;;  %s1072_s27 = smov 0  }
   0x7   :  { %s1074_s28 = smov 0   ;;  %s1076_s29 = smov 0  }
   0x8 LB: > { %s1091_s4 = sadd.s32 4294967295, %s1014_s29   ;;  %s832_s30 = sadd.s32 4294967294, %s1014_s29   ;;  %s1014_s29 = sphi %s1076_s29, %s1516_s29   ;;  %s1010_s28 = sphi %s1074_s28, %s1515_s28   ;;  %s1006_s27 = sphi %s1072_s27, %s1514_s27   ;;  %s1002_s26 = sphi %s1070_s26, %s1513_s26  }
   0x9   : > { %s1095_s8 = sadd.s32 1, %s1014_s29   ;;  %s53_s9 = sadd.s32 1, %s1010_s28 }
   0xa   : > { %s50_s10 = ssub.s32 %s1014_s29, %s1095_s8  ;;  %p60_p0 = scmp.ne.s32.totalorder %s1010_s28, %s1006_s27 }
   0xb   : > { %p51_p1 = scmp.eq.s32.totalorder %s50_s10, 0  ;;  %p61_p2 = scmp.eq.s32.totalorder %s1014_s29, 0 }
   0xc   : > { %p66_p3 = scmp.ne.s32.totalorder %s1006_s27, %s1002_s26  ;;  %p67_p4 = scmp.eq.s32.totalorder %s1091_s4, 0 }
   0xd   : > { %s1107_s11 = scalar_select %p51_p1, %s1010_s28, %s53_s9  }
   0xe   : > { %p1109_p5 = por %p61_p2, %p60_p0  ;;  %p1113_p6 = por %p67_p4, %p66_p3 }
   0xf   : > { %p195_p7 = scmp.eq.s32.totalorder %s1091_s4, 1  ;;  %p201_p8 = scmp.eq.s32.totalorder %s832_s30, 1 }
  0x10   : > { %s1502_s13 = scalar_select %p1113_p6, 1, 0 }
  0x11   : > { %p873_p10 = scmp.lt.s32.totalorder %s1014_s29, 2  ;;  %p1120_p11 = por %p195_p7, %p60_p0 }
  0x12   : > { %p1124_p12 = por %p201_p8, %p66_p3  ;;  %s239_s16 = sand.u32 1, %s1010_s28  }
  0x13   : > { %s1503_s14 = scalar_select %p1120_p11, 1, 0 }
  0x14   : > { %s1504_s15 = scalar_select %p1124_p12, 1, 0 }
  0x15   : > { %s859_s17 = sshll.u32 %s1014_s29, 8  ;;  %s835_s18 = sshll.u32 %s239_s16, 4 }
  0x16   : > { %s1133_s21 = scalar_lea.hbm %s1491_s1, %s859_s17  ;;  %s243_s22 = scalar_lea.vmem [#allocation3], %s835_s18 }
  0x17   : > { %s251_s23 = sshll.u32 %s243_s22, 4  ;;  %p1137_p13 = pnand %p873_p10, %p1109_p5  ;;  %s1141_s23 = int_to_ptr.vmem [resolvable:$true] %s251_s23 }
  0x18   : > { %s240_s25 = scalar_lea.sflag [#allocation4], %s239_s16  ;;  %s922_s30 = scalar_lea.hbm %s1133_s21, 256 }
  0x19   : > { %p923_p2 = scmp.ne.s32.totalorder %s1133_s21, %s922_s30  ;;  %p924_p3 = pneg %p1137_p13 }
  0x1a   : > { %s927_s12 = scalar_lea.hbm %s1491_s1, 512  ;;  %p928_p5 = scmp.lt.s32.totalorder %s1133_s21, %s1491_s1 }
  0x1b   : > { %p925_p4 = pnand %p924_p3, %p923_p2  ;;  %p929_p8 = scmp.lt.s32.totalorder %s927_s12, %s922_s30 }
  0x1d   : > { %p926_p7 = pneg %p925_p4  ;;  %p930_p10 = por %p929_p8, %p928_p5 }
  0x1f   : > { %p931_p9 = pnand %p930_p10, %p926_p7 }
  0x21   : > { %934 = shalt.err (!%p931_p9)
}
  0x22   : > { %s935_s16 = scalar_lea.vmem %s1141_s23, 256  ;;  %s1016_s19 = smov [#allocation3]  }
  0x23   : > { %p936_p0 = scmp.ne.s32.totalorder %s1141_s23, %s935_s16  ;;  %s940_s20 = sshll.u32 %s1016_s19, 4  ;;  %s941_s20 = int_to_ptr.vmem [resolvable:$false] %s940_s20 }
  0x24   : > { %s942_s22 = scalar_lea.vmem %s941_s20, 512  ;;  %p943_p4 = scmp.lt.s32.totalorder %s1141_s23, %s941_s20 }
  0x25   : > { %p938_p1 = pnand %p936_p0, %p924_p3  ;;  %p944_p12 = scmp.lt.s32.totalorder %s942_s22, %s935_s16 }
  0x27   : > { %p939_p2 = pneg %p938_p1  ;;  %p945_p11 = por %p944_p12, %p943_p4 }
  0x29   : > { %p946_p6 = pnand %p945_p11, %p939_p2 }
  0x2b   : > { %949 = shalt.err (!%p946_p6)
}
  0x2c   : > { %868 = dma.hbm_to_vmem [thread:$0]  (!%p1137_p13), %s1133_s21, 256, %s1141_s23, %s240_s25  }
  0x2d   : > { %p1506_p9 = scmp.lt.s32.totalorder %s1014_s29, 3  ;;  %p1507_p7 = scmp.ge.s32.totalorder %s1014_s29, 1 }
  0x2f   : > { %p257_p0 = pnand %p1507_p7, %p1506_p9 }
  0x30   : > { %s1168_s30 = sand.u32 (!%p257_p0), 1, %s1006_s27   ;;  %p1508_p6 = scmp.ne.s32.totalorder (!%p257_p0), %s1502_s13, 0 }
  0x31   : > { %260 = sbr.rel (%p257_p0) target bundleno = 1384 (0x568), region = 48  ;;  %s1500_s9 = sshll.u32 (!%p257_p0), %s1168_s30, 4 }
  0x32   : > { %s263_s10 = scalar_lea.sflag (!%p257_p0), [#allocation4], %s1168_s30  ;;  %s266_s24 = scalar_lea.vmem (!%p257_p0), [#allocation3], %s1500_s9 }
  0x36   : > { %993 = dma.done.wait (%p1508_p6), %s263_s10, 256  }
  0x37   : > { %995 = vsyncadd (%p1508_p6), %s263_s10, 4294967040  ;;  %v1178_v1 = vld [vmem:[%s266_s24] sm:$0xff]  ;;  %s1017_s21 = smov 113   ;;  %s1018_s23 = smov 111   ;;  %v1184_v2 = vld [vmem:[%s266_s24 + $0x8] sm:$0xff]  ;;  %v1023_v3 = vmov 0   ;;  %v304_v5 = vlaneseq }
  0x38   : > { %426 = vrot.lane.b32.xlu1 %v1178_v1, %s1017_s21  ;;  %470 = vrot.lane.b32.xlu0 %v1178_v1, %s1018_s23  ;;  %s1019_s13 = smov 112   ;;  %s1020_s25 = smov 127   ;;  %v503_v4 = vld [vmem:[%s1493_s3] sm:$0xff]  ;;  %v848_v10 = vld [vmem:[%s1490_s0 + $0x10] sm:$0x3]  ;;  %vm513_vm3 = vcmask 1043456  }
  0x39   : > { %s1021_s12 = smov 15   ;;  %s1022_s17 = smov 1   ;;  %552 = vmatprep.mubr.bf16.mxu0 %v1023_v3  ;;  %916 = vset.pattern.permute.xlu0 %v1023_v3  ;;  %v312_v6 = vshrl.u32 %v304_v5, 7  ;;  %v1217_v7 = vand.u32 127, %v304_v5  ;;  %v846_v13 = vld [vmem:[%s1490_s0 + $0xc] sm:$0x3] }
  0x3a   : > { %917 = vset.pattern.permute.xlu1 %v1023_v3  ;;  %718 = vmatprep.mubr.bf16.mxu1 %v1023_v3  ;;  %s1024_s18 = smov 17   ;;  %s1025_s16 = smov 16   ;;  %v847_v15 = vld [vmem:[%s1490_s0 + $0xe] sm:$0x3]  ;;  %v845_v20 = vld [vmem:[%s1490_s0 + $0xa] sm:$0x3] }
  0x3b   : > { %v1219_v8 = vsub.s32 0, %v312_v6  ;;  %v1221_v9 = vsub.s32 1, %v312_v6  ;;  %vm474_vm0 = vcmp.lt.s32.totalorder %v1217_v7, 111  ;;  %vm430_vm1 = vcmp.lt.s32.totalorder %v1217_v7, 113  ;;  %v844_v25 = vld [vmem:[%s1490_s0 + $0x8] sm:$0x3] }
  0x3c   : > { %428 = vrot.lane.b32.xlu1 %v1184_v2, %s1017_s21  ;;  %472 = vrot.lane.b32.xlu0 %v1184_v2, %s1018_s23  ;;  %vm452_vm2 = vcmp.lt.s32.totalorder %v1217_v7, 112  ;;  %vm408_vm4 = vcmp.lt.s32.totalorder %v1217_v7, 127  ;;  %v842_v56 = vld [vmem:[%s1490_s0 + $0x4] sm:$0x3]  ;;  %v843_v57 = vld [vmem:[%s1490_s0 + $0x6] sm:$0x3] }
  0x3d   : > { %v1231_v14 = vrot.slane %v848_v10, %v1219_v8  ;;  %v1237_v16 = vrot.slane %v848_v10, %v1221_v9  ;;  %v1241_v17 = vrot.slane %v846_v13, %v1219_v8  ;;  %v1248_v21 = vrot.slane %v846_v13, %v1221_v9  ;;  %s748_s20 = scalar_lea.sflag [#allocation5], %s1168_s30  ;;  %p1510_p12 = scmp.ne.s32.totalorder %s1503_s14, 0 }
  0x3e   : > { %v1255_v24 = vrot.slane %v847_v15, %v1219_v8  ;;  %v1264_v28 = vrot.slane %v847_v15, %v1221_v9  ;;  %v1271_v31 = vrot.slane %v845_v20, %v1219_v8  ;;  %v1274_v36 = vrot.slane %v844_v25, %v1221_v9 }
  0x3f   : > { %v1277_v37 = vrot.slane %v844_v25, %v1219_v8  ;;  %v1285_v41 = vrot.slane %v845_v20, %v1221_v9  ;;  %vm349_vm5 = vcmp.lt.s32.totalorder %v1217_v7, 15  ;;  %v1310_v62 = vrot.slane %v842_v56, %v1219_v8  ;;  %v309_v20 = vld [vmem:[%s1490_s0] sm:$0x3] }
  0x40   : > { %450 = vrot.lane.b32.xlu1 %v1184_v2, %s1019_s13  ;;  %448 = vrot.lane.b32.xlu0 %v1178_v1, %s1019_s13  ;;  %v403_v50 = vmul.f32 %v1274_v36, %v1184_v2  ;;  %v1313_v63 = vrot.slane %v842_v56, %v1221_v9  ;;  %vm371_vm6 = vcmp.lt.s32.totalorder %v1217_v7, 1  ;;  %v1317_v0 = vrot.slane %v843_v57, %v1219_v8  ;;  %v851_v56 = vld [vmem:[#allocation2] ss:$0 sm:$0xff] }
  0x41   : > { %v402_v51 = vmul.f32 %v1277_v37, %v1178_v1  ;;  %v1320_v3 = vrot.slane %v843_v57, %v1221_v9  ;;  %vm306_vm7 = vcmp.lt.s32.totalorder %v1217_v7, 17  ;;  %vm327_vm8 = vcmp.lt.s32.totalorder %v1217_v7, 16 }
  0x42   : > { %vm509_vm9 = vcmask 588800  }
  0x44   : > { %406 = vrot.lane.b32.xlu1 %v1184_v2, %s1020_s25  ;;  %404 = vrot.lane.b32.xlu0 %v1178_v1, %s1020_s25 }
  0x48   : > { %347 = vrot.lane.b32.xlu1 %v1184_v2, %s1021_s12  ;;  %345 = vrot.lane.b32.xlu0 %v1178_v1, %s1021_s12 }
  0x4c   : > { %369 = vrot.lane.b32.xlu1 %v1184_v2, %s1022_s17  ;;  %367 = vrot.lane.b32.xlu0 %v1178_v1, %s1022_s17 }
  0x50   : > { %302 = vrot.lane.b32.xlu1 %v1184_v2, %s1024_s18  ;;  %300 = vrot.lane.b32.xlu0 %v1178_v1, %s1024_s18 }
  0x54   : > { %325 = vrot.lane.b32.xlu1 %v1184_v2, %s1025_s16  ;;  %323 = vrot.lane.b32.xlu0 %v1178_v1, %s1025_s16 }
  0x58   : > { %506 = vperm.xlu0 %916, %v503_v4  }
  0xaa   : > { %v427_v11 = vpop.permute.xlu1 %426  ;;  %v471_v12 = vpop.permute.xlu0 %470 }
  0xae   : > { %v429_v18 = vpop.permute.xlu1 %428  ;;  %v473_v19 = vpop.permute.xlu0 %472 }
  0xaf   : > { %v475_v22 = vsel %vm474_vm0, %v471_v12, %v473_v19  ;;  %v476_v23 = vsel %vm474_vm0, %v473_v19, %v471_v12  ;;  %v431_v26 = vsel %vm430_vm1, %v427_v11, %v429_v18  ;;  %v432_v30 = vsel %vm430_vm1, %v429_v18, %v427_v11 }
  0xb0   : > { %v490_v27 = vmul.f32 %v1231_v14, %v475_v22  ;;  %v491_v29 = vmul.f32 %v1237_v16, %v476_v23  ;;  %v446_v38 = vmul.f32 %v1241_v17, %v431_v26  ;;  %v447_v42 = vmul.f32 %v1248_v21, %v432_v30  ;;  %v841_v22 = vld [vmem:[%s1490_s0 + $0x2] sm:$0x3] }
  0xb1   : > { %v1345_v30 = vrot.slane %v309_v20, %v1221_v9 }
  0xb2   : > { %v451_v32 = vpop.permute.xlu1 %450  ;;  %v449_v33 = vpop.permute.xlu0 %448  ;;  %v502_v34 = vpack.c.bf16 %v491_v29, %v491_v29  ;;  %v501_v35 = vpack.c.bf16 %v490_v27, %v490_v27  ;;  %v1342_v29 = vrot.slane %v309_v20, %v1219_v8 }
  0xb3   : > { %v453_v39 = vsel %vm452_vm2, %v449_v33, %v451_v32  ;;  %v454_v40 = vsel %vm452_vm2, %v451_v32, %v449_v33  ;;  %v1349_v32 = vrot.slane %v841_v22, %v1219_v8  ;;  %v1352_v33 = vrot.slane %v841_v22, %v1221_v9 }
  0xb4   : > { %v468_v43 = vmul.f32 %v1255_v24, %v453_v39  ;;  %v469_v44 = vmul.f32 %v1264_v28, %v454_v40  ;;  %849 = vmatprep.subr.msk.bf16.mxu0 %vm513_vm3, %v502_v34  ;;  %v515_v45 = vsel %vm513_vm3, %v501_v35, 0 }
  0xb5   : > { %527 = vmatpush1.bf16.msra.mxu0 %v515_v45 }
  0xb6   : > { %v407_v46 = vpop.permute.xlu1 %406  ;;  %v405_v47 = vpop.permute.xlu0 %404  ;;  %v500_v48 = vpack.c.bf16 %v469_v44, %v447_v42  ;;  %v499_v49 = vpack.c.bf16 %v468_v43, %v446_v38 }
  0xb7   : > { %v409_v52 = vsel %vm408_vm4, %v405_v47, %v407_v46  ;;  %v410_v53 = vsel %vm408_vm4, %v407_v46, %v405_v47  ;;  %v492_v47 = vld [vmem:[%s1492_s2] sm:$0xf] }
  0xb8   : > { %v424_v54 = vmul.f32 %v1271_v31, %v409_v52  ;;  %v425_v55 = vmul.f32 %v1285_v41, %v410_v53  ;;  %528 = vmatprep.subr.bf16.mxu0 %v500_v48 }
  0xb9   : > { %529 = vmatpush1.bf16.msra.mxu0 %v499_v49 }
  0xba   : > { %v348_v58 = vpop.permute.xlu1 %347  ;;  %v346_v59 = vpop.permute.xlu0 %345  ;;  %v498_v60 = vpack.c.bf16 %v425_v55, %v403_v50  ;;  %v497_v61 = vpack.c.bf16 %v424_v54, %v402_v51 }
  0xbb   : > { %v350_v4 = vsel %vm349_vm5, %v346_v59, %v348_v58  ;;  %v351_v5 = vsel %vm349_vm5, %v348_v58, %v346_v59 }
  0xbc   : > { %530 = vmatprep.subr.bf16.mxu0 %v498_v60  ;;  %v365_v13 = vmul.f32 %v1310_v62, %v351_v5  ;;  %v366_v15 = vmul.f32 %v1313_v63, %v350_v4 }
  0xbd   : > { %531 = vmatpush1.bf16.msra.mxu0 %v497_v61 }
  0xbe   : > { %v370_v6 = vpop.permute.xlu1 %369  ;;  %v368_v10 = vpop.permute.xlu0 %367 }
  0xbf   : > { %v372_v11 = vsel %vm371_vm6, %v368_v10, %v370_v6  ;;  %v373_v12 = vsel %vm371_vm6, %v370_v6, %v368_v10 }
  0xc0   : > { %v387_v18 = vmul.f32 %v1317_v0, %v373_v12  ;;  %v388_v19 = vmul.f32 %v1320_v3, %v372_v11 }
  0xc2   : > { %v303_v23 = vpop.permute.xlu1 %302  ;;  %v301_v25 = vpop.permute.xlu0 %300  ;;  %v496_v26 = vpack.c.bf16 %v388_v19, %v366_v15  ;;  %v495_v27 = vpack.c.bf16 %v387_v18, %v365_v13 }
  0xc3   : > { %v307_v34 = vsel %vm306_vm7, %v301_v25, %v303_v23  ;;  %v308_v35 = vsel %vm306_vm7, %v303_v23, %v301_v25  ;;  %v671_v25 = vld [vmem:[%s1496_s6] sm:$0xff] }
  0xc4   : > { %532 = vmatprep.subr.bf16.mxu0 %v496_v26  ;;  %v321_v8 = vmul.f32 %v1342_v29, %v308_v35  ;;  %v322_v9 = vmul.f32 %v1345_v30, %v307_v34 }
  0xc5   : > { %533 = vmatpush1.bf16.msra.mxu0 %v495_v27 }
  0xc6   : > { %v326_v38 = vpop.permute.xlu1 %325  ;;  %v324_v39 = vpop.permute.xlu0 %323 }
  0xc7   : > { %v328_v40 = vsel %vm327_vm8, %v324_v39, %v326_v38  ;;  %v329_v42 = vsel %vm327_vm8, %v326_v38, %v324_v39 }
  0xc8   : > { %v343_v43 = vmul.f32 %v1349_v32, %v329_v42  ;;  %v344_v44 = vmul.f32 %v1352_v33, %v328_v40 }
  0xca   : > { %v494_v45 = vpack.c.bf16 %v344_v44, %v322_v9  ;;  %v493_v46 = vpack.c.bf16 %v343_v43, %v321_v8 }
  0xcc   : > { %534 = vmatprep.subr.bf16.mxu0 %v494_v45 }
  0xcd   : > { %535 = vmatpush1.bf16.msra.mxu0 %v493_v46 }
  0xd0   : > { %850 = vmatmul.mubr.msk.bf16.vlgmr.msra.gmra.mxu0 %vm509_vm9, %v492_v47 }
  0xd3   : > { %v507_v48 = vpop.permute.xlu0 %506 }
 0x190   : > { %v554_v49 = vpop.f32.mrf.mxu0 }
 0x191   : > { %v555_v51 = vadd.f32 %v554_v49, %v507_v48 }
 0x192   : > { %v556_v50 = vpop.f32.mrf.mxu0 }
 0x193   : > { %v557_v52 = vadd.f32 %v556_v50, %v507_v48 }
 0x194   : > { %v558_v53 = vpop.f32.mrf.mxu0 }
 0x195   : > { %v561_v54 = vadd.f32 %v557_v52, %v555_v51 }
 0x196   : > { %v559_v55 = vpop.f32.mrf.mxu0 }
 0x197   : > { %562 = vadd.xlane.f32.xlu1 %v561_v54 }
 0x1a8   : > { %587 = vperm.xlu1 %917, %v851_v56  }
 0x220   : > { %v563_v57 = vpop.xlane.xlu1 %562 }
 0x221   : > { %v565_v58 = vmul.f32 0.00390625, %v563_v57 }
 0x223   : > { %v566_v59 = vsub.f32 %v555_v51, %v565_v58  ;;  %v567_v60 = vsub.f32 %v557_v52, %v565_v58 }
 0x224   : > { %v588_v13 = vpop.permute.xlu1 %587 }
 0x225   : > { %v568_v61 = vmul.f32 %v566_v59, %v566_v59  ;;  %v569_v4 = vmul.f32 %v567_v60, %v567_v60 }
 0x227   : > { %v570_v5 = vadd.f32 %v569_v4, %v568_v61 }
 0x229   : > { %571 = vadd.xlane.f32.xlu0 %v570_v5 }
 0x2b2   : > { %v572_v6 = vpop.xlane.xlu0 %571 }
 0x2b3   : > { %v573_v10 = vmul.f32 0.00390625, %v572_v6 }
 0x2b5   : > { %v574_v11 = vadd.f32 1e-05, %v573_v10 }
 0x2b7   : > { %918 = vrsqrt.f32 %v574_v11 }
 0x2c4   : > { %v919_v12 = vpop.eup %918 }
 0x2c5   : > { %v576_v15 = vmul.f32 %v919_v12, %v566_v59  ;;  %v577_v18 = vmul.f32 %v919_v12, %v567_v60 }
 0x2c7   : > { %vm578_vm10 = vcmp.ge.f32.partialorder %v576_v15, 0.0  ;;  %vm579_vm11 = vcmp.ge.f32.partialorder %v577_v18, 0.0  ;;  %v590_v19 = vmul.f32 %v588_v13, %v576_v15  ;;  %v591_v20 = vmul.f32 %v588_v13, %v577_v18 }
 0x2c9   : > { %v592_v22 = vsel %vm578_vm10, %v576_v15, %v590_v19  ;;  %v593_v23 = vsel %vm579_vm11, %v577_v18, %v591_v20 }
 0x2ca   : > { %654 = vrot.lane.b32.xlu1 %v593_v23, %s1018_s23  ;;  %652 = vrot.lane.b32.xlu0 %v592_v22, %s1018_s23 }
 0x2ce   : > { %636 = vrot.lane.b32.xlu1 %v592_v22, %s1017_s21  ;;  %638 = vrot.lane.b32.xlu0 %v593_v23, %s1017_s21 }
 0x2d2   : > { %644 = vrot.lane.b32.xlu1 %v592_v22, %s1019_s13  ;;  %646 = vrot.lane.b32.xlu0 %v593_v23, %s1019_s13 }
 0x2d6   : > { %628 = vrot.lane.b32.xlu1 %v592_v22, %s1020_s25  ;;  %630 = vrot.lane.b32.xlu0 %v593_v23, %s1020_s25 }
 0x2da   : > { %610 = vrot.lane.b32.xlu1 %v592_v22, %s1021_s12  ;;  %612 = vrot.lane.b32.xlu0 %v593_v23, %s1021_s12  ;;  %s860_s12 = sshll.u32 %s1091_s4, 8  ;;  %s1026_s4 = smov [#allocation6]  }
 0x2db   : > { %s1453_s19 = scalar_lea.hbm %s1497_s7, %s860_s12  ;;  %s954_s22 = sshll.u32 %s1026_s4, 4  ;;  %s955_s22 = int_to_ptr.vmem [resolvable:$false] %s954_s22 }
 0x2dc   : > { %s956_s21 = scalar_lea.vmem %s955_s22, 512 }
 0x2de   : > { %618 = vrot.lane.b32.xlu1 %v592_v22, %s1022_s17  ;;  %620 = vrot.lane.b32.xlu0 %v593_v23, %s1022_s17  ;;  %s1509_s17 = sshll.u32 %s1168_s30, 4 }
 0x2e2   : > { %594 = vrot.lane.b32.xlu1 %v592_v22, %s1024_s18  ;;  %596 = vrot.lane.b32.xlu0 %v593_v23, %s1024_s18  ;;  %s296_s18 = scalar_lea.vmem [#allocation6], %s1509_s17 }
 0x2e6   : > { %602 = vrot.lane.b32.xlu1 %v592_v22, %s1025_s16  ;;  %604 = vrot.lane.b32.xlu0 %v593_v23, %s1025_s16  ;;  %s762_s16 = sshll.u32 %s296_s18, 4  ;;  %s763_s16 = int_to_ptr.vmem [resolvable:$true] %s762_s16 }
 0x2e7   : > { %s950_s9 = scalar_lea.vmem %s763_s16, 256  ;;  %p957_p3 = scmp.lt.s32.totalorder %s763_s16, %s955_s22 }
 0x2e8   : > { %p951_p11 = scmp.ne.s32.totalorder %s763_s16, %s950_s9  ;;  %p958_p5 = scmp.lt.s32.totalorder %s956_s21, %s950_s9 }
 0x2ea   : > { %674 = vperm.xlu1 %917, %v671_v25   ;;  %p952_p13 = pnand %p951_p11, %p1510_p12  ;;  %p959_p8 = por %p958_p5, %p957_p3 }
 0x2ec   : > { %p953_p1 = pneg %p952_p13 }
 0x2ee   : > { %p960_p10 = pnand %p959_p8, %p953_p1 }
 0x33c   : > { %v655_v26 = vpop.permute.xlu1 %654  ;;  %v653_v27 = vpop.permute.xlu0 %652 }
 0x33d   : > { %v656_v34 = vsel %vm474_vm0, %v653_v27, %v655_v26  ;;  %v657_v35 = vsel %vm474_vm0, %v655_v26, %v653_v27 }
 0x33e   : > { %v658_v38 = vmul.f32 %v656_v34, %v1231_v14  ;;  %v659_v39 = vmul.f32 %v657_v35, %v1237_v16 }
 0x340   : > { %v637_v40 = vpop.permute.xlu1 %636  ;;  %v639_v42 = vpop.permute.xlu0 %638  ;;  %v670_v8 = vpack.c.bf16 %v659_v39, %v659_v39  ;;  %v669_v9 = vpack.c.bf16 %v658_v38, %v658_v38  ;;  %v660_v38 = vld [vmem:[%s1495_s5] sm:$0xf] }
 0x341   : > { %v640_v44 = vsel %vm430_vm1, %v637_v40, %v639_v42  ;;  %v641_v45 = vsel %vm430_vm1, %v639_v42, %v637_v40 }
 0x342   : > { %852 = vmatprep.subr.msk.bf16.mxu1 %vm513_vm3, %v670_v8  ;;  %v681_v43 = vsel %vm513_vm3, %v669_v9, 0  ;;  %v642_v48 = vmul.f32 %v640_v44, %v1241_v17  ;;  %v643_v49 = vmul.f32 %v641_v45, %v1248_v21  ;;  %v627_v21 = vmul.f32 %v593_v23, %v1274_v36 }
 0x343   : > { %693 = vmatpush1.bf16.msra.mxu1 %v681_v43 }
 0x344   : > { %v645_v46 = vpop.permute.xlu1 %644  ;;  %v647_v47 = vpop.permute.xlu0 %646 }
 0x345   : > { %v648_v14 = vsel %vm452_vm2, %v645_v46, %v647_v47  ;;  %v649_v16 = vsel %vm452_vm2, %v647_v47, %v645_v46 }
 0x346   : > { %v650_v50 = vmul.f32 %v648_v14, %v1255_v24  ;;  %v651_v51 = vmul.f32 %v649_v16, %v1264_v28  ;;  %v626_v24 = vmul.f32 %v592_v22, %v1277_v37 }
 0x348   : > { %v629_v52 = vpop.permute.xlu1 %628  ;;  %v631_v53 = vpop.permute.xlu0 %630  ;;  %v668_v54 = vpack.c.bf16 %v651_v51, %v643_v49  ;;  %v667_v55 = vpack.c.bf16 %v650_v50, %v642_v48 }
 0x349   : > { %v632_v56 = vsel %vm408_vm4, %v629_v52, %v631_v53  ;;  %v633_v57 = vsel %vm408_vm4, %v631_v53, %v629_v52 }
 0x34a   : > { %v634_v58 = vmul.f32 %v632_v56, %v1271_v31  ;;  %v635_v17 = vmul.f32 %v633_v57, %v1285_v41  ;;  %694 = vmatprep.subr.bf16.mxu1 %v668_v54 }
 0x34b   : > { %695 = vmatpush1.bf16.msra.mxu1 %v667_v55 }
 0x34c   : > { %v611_v28 = vpop.permute.xlu1 %610  ;;  %v613_v59 = vpop.permute.xlu0 %612  ;;  %v666_v60 = vpack.c.bf16 %v635_v17, %v627_v21  ;;  %v665_v61 = vpack.c.bf16 %v634_v58, %v626_v24 }
 0x34d   : > { %v614_v4 = vsel %vm349_vm5, %v611_v28, %v613_v59  ;;  %v615_v5 = vsel %vm349_vm5, %v613_v59, %v611_v28 }
 0x34e   : > { %696 = vmatprep.subr.bf16.mxu1 %v666_v60  ;;  %v616_v6 = vmul.f32 %v615_v5, %v1310_v62  ;;  %v617_v10 = vmul.f32 %v614_v4, %v1313_v63 }
 0x34f   : > { %697 = vmatpush1.bf16.msra.mxu1 %v665_v61 }
 0x350   : > { %v619_v31 = vpop.permute.xlu1 %618  ;;  %v621_v41 = vpop.permute.xlu0 %620 }
 0x351   : > { %v622_v36 = vsel %vm371_vm6, %v619_v31, %v621_v41  ;;  %v623_v37 = vsel %vm371_vm6, %v621_v41, %v619_v31 }
 0x352   : > { %v624_v11 = vmul.f32 %v623_v37, %v1317_v0  ;;  %v625_v12 = vmul.f32 %v622_v36, %v1320_v3 }
 0x354   : > { %v595_v13 = vpop.permute.xlu1 %594  ;;  %v597_v15 = vpop.permute.xlu0 %596  ;;  %v664_v18 = vpack.c.bf16 %v625_v12, %v617_v10  ;;  %v663_v19 = vpack.c.bf16 %v624_v11, %v616_v6 }
 0x355   : > { %v598_v20 = vsel %vm306_vm7, %v595_v13, %v597_v15  ;;  %v599_v22 = vsel %vm306_vm7, %v597_v15, %v595_v13 }
 0x356   : > { %698 = vmatprep.subr.bf16.mxu1 %v664_v18  ;;  %v600_v3 = vmul.f32 %v599_v22, %v1342_v29  ;;  %v601_v25 = vmul.f32 %v598_v20, %v1345_v30 }
 0x357   : > { %699 = vmatpush1.bf16.msra.mxu1 %v663_v19 }
 0x358   : > { %v603_v23 = vpop.permute.xlu1 %602  ;;  %v605_v62 = vpop.permute.xlu0 %604 }
 0x359   : > { %v606_v63 = vsel %vm327_vm8, %v603_v23, %v605_v62  ;;  %v607_v0 = vsel %vm327_vm8, %v605_v62, %v603_v23 }
 0x35a   : > { %v608_v26 = vmul.f32 %v607_v0, %v1349_v32  ;;  %v609_v27 = vmul.f32 %v606_v63, %v1352_v33 }
 0x35c   : > { %v662_v34 = vpack.c.bf16 %v609_v27, %v601_v25  ;;  %v661_v35 = vpack.c.bf16 %v608_v26, %v600_v3 }
 0x35e   : > { %700 = vmatprep.subr.bf16.mxu1 %v662_v34 }
 0x35f   : > { %701 = vmatpush1.bf16.msra.mxu1 %v661_v35 }
 0x362   : > { %853 = vmatmul.mubr.msk.bf16.vlgmr.msra.gmra.mxu1 %vm509_vm9, %v660_v38 }
 0x365   : > { %v675_v39 = vpop.permute.xlu1 %674 }
 0x422   : > { %v720_v7 = vpop.f32.mrf.mxu1 }
 0x423   : > { %v721_v29 = vadd.f32 %v720_v7, %v675_v39 }
 0x424   : > { %v722_v40 = vpop.f32.mrf.mxu1 }
 0x425   : > { %v723_v42 = vadd.f32 %v722_v40, %v675_v39 }
 0x426   : > { %v724_v30 = vpop.f32.mrf.mxu1 }
 0x427   : > { %v727_v8 = vadd.f32 %v723_v42, %v721_v29 }
 0x428   : > { %v725_v32 = vpop.f32.mrf.mxu1 }
 0x429   : > { %728 = vadd.xlane.f32.xlu0 %v727_v8 }
 0x4b2   : > { %v729_v33 = vpop.xlane.xlu0 %728 }
 0x4b3   : > { %v730_v9 = vmul.f32 0.00390625, %v729_v33 }
 0x4b5   : > { %v731_v43 = vsub.f32 %v721_v29, %v730_v9  ;;  %v732_v44 = vsub.f32 %v723_v42, %v730_v9 }
 0x4b7   : > { %v733_v45 = vmul.f32 %v731_v43, %v731_v43  ;;  %v734_v46 = vmul.f32 %v732_v44, %v732_v44 }
 0x4b9   : > { %v735_v47 = vadd.f32 %v734_v46, %v733_v45 }
 0x4bb   : > { %736 = vadd.xlane.f32.xlu1 %v735_v47 }
 0x544   : > { %v737_v14 = vpop.xlane.xlu1 %736 }
 0x545   : > { %v738_v16 = vmul.f32 0.00390625, %v737_v14 }
 0x547   : > { %v739_v48 = vadd.f32 1e-05, %v738_v16 }
 0x549   : > { %920 = vrsqrt.f32 %v739_v48 }
 0x556   : > { %v921_v49 = vpop.eup %920 }
 0x557   : > { %v741_v50 = vmul.f32 %v921_v49, %v731_v43  ;;  %v742_v51 = vmul.f32 %v921_v49, %v732_v44 }
 0x559   : > { %v743_v52 = vadd.f32 %v741_v50, %v1178_v1  ;;  %v744_v53 = vadd.f32 %v742_v51, %v1184_v2 }
 0x55b   : > { %745 = vst [vmem:[%s296_s18] sm:$0xff] %v743_v52  ;;  %746 = vst [vmem:[%s296_s18 + $0x8] sm:$0xff] %v744_v53 }
 0x55c   : > { %963 = shalt.err (!%p960_p10)
}
 0x55d   : > { %s964_s23 = scalar_lea.hbm %s1453_s19, 256  ;;  %s968_s25 = scalar_lea.hbm %s1497_s7, 512 }
 0x55e   : > { %p965_p2 = scmp.ne.s32.totalorder %s1453_s19, %s964_s23  ;;  %p969_p7 = scmp.lt.s32.totalorder %s1453_s19, %s1497_s7 }
 0x55f   : > { %p970_p0 = scmp.lt.s32.totalorder %s968_s25, %s964_s23 }
 0x560   : > { %p966_p4 = pnand %p965_p2, %p1510_p12 }
 0x561   : > { %p971_p6 = por %p970_p0, %p969_p7 }
 0x562   : > { %p967_p9 = pneg %p966_p4 }
 0x564   : > { %p972_p11 = pnand %p971_p6, %p967_p9 }
 0x566   : > { %975 = shalt.err (!%p972_p11)
}
 0x567   : > { %863 = dma.vmem_to_hbm [thread:$0]  (%p1510_p12), %s763_s16, 256, %s1453_s19, %s748_s20  }
 0x568 PF: > { %s774_s18 = sand.u32 1, %s1002_s26   ;;  %p1511_p13 = scmp.ne.s32.totalorder %s1504_s15, 0 }
 0x569   : > { %p1512_p1 = scmp.ge.s32.totalorder %s1014_s29, 2  ;;  %s775_s10 = scalar_lea.sflag [#allocation5], %s774_s18 }
 0x56b   : > { %p870_p3 = pnand %p1512_p1, %p1511_p13 }
 0x56d   : > { %p871_p5 = pneg %p870_p3 }
 0x56f   : > { %997 = dma.done.wait (%p871_p5), %s775_s10, 256  }
 0x570   : > { %999 = vsyncadd (%p871_p5), %s775_s10, 4294967040  ;;  %p22_p8 = scmp.ge.s32.totalorder %s1095_s8, 4   ;;  %s1513_s26 = smov %s1006_s27 }
 0x571   : > { %s1514_s27 = smov %s1010_s28  ;;  %s1515_s28 = smov %s1107_s11 }
 0x572   : > { %s1516_s29 = smov %s1095_s8  ;;  %24 = sbr.rel (!%p22_p8) target bundleno = 8 (0x8), region = 101 }
 0x577   :  { %780 = vsyncpa [#allocation4], 1 }
 0x578   :  { %782 = vsyncpa [#allocation4 + $0x1], 1 }
 0x579   :  { %783 = vsyncpa [#allocation5], 1 }
 0x57a   :  { %785 = vsyncpa [#allocation5 + $0x1], 1 }

</bundles_post_ra>
